<compile_context>
chip_gen: v5e
topology: v5e:2x2
jax: 0.10.0
libtpu: 0.0.40
codegen_flags: <defaults>
</compile_context>

<pallas_src>
import numpy as np
import jax
import jax.numpy as jnp
from jax import lax
from jax.experimental import pallas as pl
from jax.experimental.pallas import tpu as pltpu


# ---------------------------------------------------------------------------
# Parameter construction (deterministic, numpy) — mirrors transition('lmu', N)
# and scipy.signal.cont2discrete(..., method='bilinear').
# ---------------------------------------------------------------------------
def lmu_transition(N):
    Q = np.arange(N, dtype=np.float64)
    R = (2 * Q + 1)[:, None]
    j, i = np.meshgrid(Q, Q)
    A = np.where(i < j, -1.0, (-1.0) ** (i - j + 1)) * R
    B = (-1.0) ** Q[:, None] * R  # (N, 1)
    return A, B


def bilinear_discretize(A, B, dt):
    N = A.shape[0]
    I = np.eye(N)
    ima = I - (dt / 2.0) * A
    Ad = np.linalg.solve(ima, I + (dt / 2.0) * A)
    Bd = np.linalg.solve(ima, dt * B)
    return Ad, Bd.squeeze(-1)  # (N, N), (N,)


# TODO(synk): eval_matrix (scipy eval_legendre) is only used by reconstruct(),
# not by forward(), so it is intentionally not materialized here.


# ---------------------------------------------------------------------------
# Chunk-operator precompute (host, float64 for accuracy, cast to f32).
# ---------------------------------------------------------------------------
def build_chunk_operators(A, B, T):
    """Returns (Kmat (T,T*N), Pstack (N,T*N), AtT (N,N), Kcarry (T,N)) as f32."""
    N = A.shape[0]
    At = np.asarray(A, np.float64).T                 # right-multiply matrix A^T
    Brow = np.asarray(B, np.float64).reshape(1, N)

    powers = [np.eye(N)]
    for _ in range(T):
        powers.append(powers[-1] @ At)               # powers[k] = (A^T)^k

    K = [Brow @ powers[d] for d in range(T)]         # K[d] = B @ (A^T)^d, (1,N)

    Kmat = np.zeros((T, T * N), np.float64)
    for j in range(T):
        for k in range(j, T):
            Kmat[j, k * N:(k + 1) * N] = K[k - j][0]

    Pstack = np.zeros((N, T * N), np.float64)
    for k in range(T):
        Pstack[:, k * N:(k + 1) * N] = powers[k + 1]

    AtT = powers[T]                                  # (A^T)^T (matrix power T)
    Kcarry = np.stack([K[T - 1 - j][0] for j in range(T)], axis=0)  # (T, N)

    f32 = lambda a: jnp.asarray(a, jnp.float32)
    return f32(Kmat), f32(Pstack), f32(AtT), f32(Kcarry)


# ---------------------------------------------------------------------------
# Per-generation targets / tile selection.
# ---------------------------------------------------------------------------
def _round_up(a, b):
    return (a + b - 1) // b * b


def _tpu_target():
    """Best-effort TPU-generation probe: MXU contraction depth, VMEM budget,
    batch-tile cap, and whether to keep >=2 batch tiles for 2-TC chips."""
    kind = ""
    try:
        d = jax.devices()[0]
        if d.platform == "tpu":
            kind = d.device_kind.lower()
    except Exception:
        pass
    if "v2" in kind or "v3" in kind:
        return dict(mxu_depth=128, vmem_limit=16 << 20, tm_cap=256, multi_tile=False)
    if "v5 lite" in kind or "v5e" in kind or "v5litepod" in kind:
        # v5e: 4x128x128 MXU -> cap T at 128; 128 MiB physical VMEM.
        return dict(mxu_depth=128, vmem_limit=64 << 20, tm_cap=256, multi_tile=False)
    if "v4" in kind or "v5" in kind:
        return dict(mxu_depth=128, vmem_limit=64 << 20, tm_cap=256, multi_tile=False)
    if "v6" in kind:
        # v6e: 2x256x256 MXU, 128 MiB VMEM -> raise the limit so large tiles
        # stay double-buffered.
        return dict(mxu_depth=256, vmem_limit=96 << 20, tm_cap=256, multi_tile=False)
    # Unknown / v7x-like: 64 MiB physical VMEM, 2 TensorCores -> conservative
    # budget and prefer >= 2 batch tiles so the "parallel" axis can shard.
    return dict(mxu_depth=256, vmem_limit=48 << 20, tm_cap=256, multi_tile=True)


def _vmem_estimate(T, tm, N, double_buffer_consts=True):
    """Rough per-step VMEM footprint (bytes), with headroom for the in-kernel
    permute intermediates and compiler scratch."""
    f32 = 4
    consts = (T * T * N + N * T * N + N * N + T * N) * f32
    consts *= 2 if double_buffer_consts else 1
    x_blk = tm * T * f32 * 2
    out_blk = T * tm * N * f32 * 2
    scratch = tm * N * f32
    temps = 2 * tm * T * N * f32
    return int(1.25 * (consts + x_blk + out_blk + scratch + temps))


def choose_tm(Mp, N, tm_cap=256, prefer_multi_tile=False):
    cands = [t for t in (512, 256, 128, 64, 32, 16, 8)
             if t <= tm_cap and Mp % t == 0 and (t * N) % 128 == 0]
    if not cands:
        return Mp                      # full-batch block (== full array dim)
    tm = cands[0]
    if prefer_multi_tile and Mp // tm < 2:
        for t in cands:
            if Mp // t >= 2:
                tm = t
                break
    return tm


def choose_T(L, N, tm, mxu_depth, vmem_limit):
    """Largest multiple-of-8 T up to the MXU contraction depth that (a) does
    not grossly over-pad L and (b) fits the per-generation VMEM budget."""
    budget = int(0.75 * vmem_limit)
    T = min(_round_up(max(L, 1), 8), _round_up(mxu_depth, 8))
    while T > 8 and _vmem_estimate(T, tm, N) > budget:
        T = max(8, _round_up(T // 2, 8))
    return T


# ---------------------------------------------------------------------------
# Pallas kernel: grid = (M_tiles "parallel", L/T chunks "arbitrary").
# The recurrence state c (tm, N) lives in VMEM scratch carried across chunks.
# ---------------------------------------------------------------------------
def _make_kernel(time_major, out_precision):
    def kernel(kmat_ref, pstack_ref, atT_ref, kcarry_ref, x_ref, o_ref, c_ref):
        # kmat_ref   : (T, T*N)    resident  (causal input->state operator)
        # pstack_ref : (N, T*N)    resident  (carry->all-steps operator)
        # atT_ref    : (N, N)      resident  ((A^T)^T carry propagator)
        # kcarry_ref : (T, N)      resident  (inputs->end-of-chunk carry)
        # x_ref      : (1, tm, T)  current chunk of inputs (batch tile m)
        # o_ref      : (T, tm*N)   time-major lane-dense output block
        #              or (1, tm, T*N) in the batch-major fallback layout
        # c_ref      : (tm, N)     VMEM scratch carrying the recurrence state
        @pl.when(pl.program_id(1) == 0)
        def _():
            c_ref[...] = jnp.zeros_like(c_ref)

        f_t = x_ref[0]                     # (tm, T)
        c0 = c_ref[...]                    # (tm, N)
        tm, T = f_t.shape
        N = c0.shape[1]

        # Non-recurrent output path: these values never feed back into the
        # carry, so 3-pass-bf16 (HIGH) precision is enough (vs 6-pass HIGHEST).
        out = (jnp.dot(f_t, kmat_ref[...],
                       preferred_element_type=jnp.float32,
                       precision=out_precision)
               + jnp.dot(c0, pstack_ref[...],
                         preferred_element_type=jnp.float32,
                         precision=out_precision))          # (tm, T*N)

        if time_major:
            # Permute to time-major (T, tm*N) inside the kernel (VMEM work that
            # hides under the MXU) so the wrapper needs no HBM-round-trip
            # transpose of the full output.
            o_ref[...] = (out.reshape(tm, T, N)
                             .swapaxes(0, 1)
                             .reshape(T, tm * N)
                             .astype(o_ref.dtype))
        else:
            o_ref[0] = out.astype(o_ref.dtype)

        # Recurrent carry update: error compounds over L/T chunks -> HIGHEST.
        c_ref[...] = (jnp.dot(c0, atT_ref[...],
                              preferred_element_type=jnp.float32,
                              precision=lax.Precision.HIGHEST)
                      + jnp.dot(f_t, kcarry_ref[...],
                                preferred_element_type=jnp.float32,
                                precision=lax.Precision.HIGHEST))
    return kernel


def _const_spec(shape, single_buffer):
    """BlockSpec for a grid-invariant (constant index_map) operator input.
    Single-buffer it when possible: double-buffering it is pure VMEM waste."""
    idx = lambda m, c, _n=len(shape): (0,) * _n
    if single_buffer and hasattr(pl, "Buffered"):
        try:
            return pl.BlockSpec(shape, idx, pipeline_mode=pl.Buffered(1))
        except Exception:
            pass
    return pl.BlockSpec(shape, idx)


def _forward_variant(x_cmt, ops, dims, target, time_major, single_buffer_consts,
                     out_precision, out_dtype):
    Kmat, Pstack, AtT, Kcarry = ops
    (L, d0, d1, N, M, Mp, Lp, T, tm, n_chunks, n_mtiles) = dims

    kernel = _make_kernel(time_major, out_precision)
    in_specs = [
        _const_spec((T, T * N), single_buffer_consts),      # Kmat resident
        _const_spec((N, T * N), single_buffer_consts),      # Pstack resident
        _const_spec((N, N), single_buffer_consts),          # (A^T)^T resident
        _const_spec((T, N), single_buffer_consts),          # Kcarry resident
        pl.BlockSpec((1, tm, T), lambda m, c: (c, m, 0)),   # chunk inputs
    ]
    if time_major:
        out_shape = jax.ShapeDtypeStruct((Lp, Mp * N), out_dtype)
        out_specs = pl.BlockSpec((T, tm * N), lambda m, c: (c, m))
    else:
        out_shape = jax.ShapeDtypeStruct((n_chunks, Mp, T * N), out_dtype)
        out_specs = pl.BlockSpec((1, tm, T * N), lambda m, c: (c, m, 0))

    out = pl.pallas_call(
        kernel,
        out_shape=out_shape,
        grid=(n_mtiles, n_chunks),
        in_specs=in_specs,
        out_specs=out_specs,
        scratch_shapes=[pltpu.VMEM((tm, N), jnp.float32)],
        compiler_params=pltpu.CompilerParams(
            dimension_semantics=("parallel", "arbitrary"),
            vmem_limit_bytes=target["vmem_limit"]),
    )(Kmat, Pstack, AtT, Kcarry, x_cmt)

    if time_major:
        out = out.reshape(Lp, Mp, N)                       # free view
    else:
        out = out.reshape(n_chunks, Mp, T, N)
        out = jnp.transpose(out, (0, 2, 1, 3)).reshape(Lp, Mp, N)
    out = out[:L, :M].reshape(L, d0, d1, N)
    return jax.block_until_ready(out)


def hippo_legt_forward(x, A, B, T=None, out_dtype=jnp.float32):
    """x: (d0, d1, L) float32 -> (L, d0, d1, N) `out_dtype` (default f32;
    bf16 halves output writeback if downstream tolerates it)."""
    d0, d1, L = x.shape
    N = A.shape[0]
    M = d0 * d1
    target = _tpu_target()

    Mp = _round_up(M, 8)
    tm = choose_tm(Mp, N, tm_cap=target["tm_cap"],
                   prefer_multi_tile=target["multi_tile"])
    if T is None:
        T = choose_T(L, N, tm, target["mxu_depth"], target["vmem_limit"])
    T = max(8, _round_up(int(T), 8))
    Lp = _round_up(L, T)                 # pad sequence to a multiple of T
    n_chunks = Lp // T
    n_mtiles = Mp // tm

    # Glue: (d0, d1, L) -> (L, M) -> padded -> (n_chunks, Mp, T)
    x_lm = jnp.transpose(x, (2, 0, 1)).reshape(L, M).astype(jnp.float32)
    x_lm = jnp.pad(x_lm, ((0, Lp - L), (0, Mp - M)))
    x_cmt = jnp.transpose(x_lm.reshape(n_chunks, T, Mp), (0, 2, 1))

    ops = build_chunk_operators(A, B, T)
    dims = (L, d0, d1, N, M, Mp, Lp, T, tm, n_chunks, n_mtiles)

    # Preferred config first; the last fallback is the previously-validated
    # batch-major layout (HIGHEST everywhere, default buffering).
    configs = (
        (True, True, lax.Precision.HIGH),
        (True, False, lax.Precision.HIGH),
        (False, False, lax.Precision.HIGHEST),
    )
    last_err = None
    for time_major, single_buf, prec in configs:
        try:
            return _forward_variant(x_cmt, ops, dims, target,
                                    time_major, single_buf, prec, out_dtype)
        except Exception as e:          # pragma: no cover — older Pallas builds
            last_err = e
    raise last_err


# ---------------------------------------------------------------------------
# Pure-JAX reference (mirrors the PyTorch loop) for verification.
# ---------------------------------------------------------------------------
def hippo_legt_ref(x, A, B):
    d0, d1, L = x.shape
    A = jnp.asarray(A, jnp.float32)
    B = jnp.asarray(B, jnp.float32)
    xs = jnp.transpose(x, (2, 0, 1)).astype(jnp.float32)   # (L, d0, d1)
    c0 = jnp.zeros((d0, d1, A.shape[0]), jnp.float32)

    def step(c, f):
        new = f[..., None] * B                              # (d0, d1, N)
        c = c @ A.T + new
        return c, c

    _, cs = jax.lax.scan(step, c0, xs)
    return cs                                               # (L, d0, d1, N)


if __name__ == "__main__":
    # Small shapes consistent with the module's forward: inputs (d0, d1, L)
    d0, d1, L, N = 2, 4, 32, 32
    dt = 1.0 / L

    A_c, B_c = lmu_transition(N)
    A_d, B_d = bilinear_discretize(A_c, B_c, dt)

    key = jax.random.PRNGKey(0)
    x = jax.random.normal(key, (d0, d1, L), dtype=jnp.float32)

    ref = hippo_legt_ref(x, A_d, B_d)

    # (a) T=8 -> 4 sequential chunks: exercises the VMEM-carried recurrence.
    out_small = jax.block_until_ready(hippo_legt_forward(x, A_d, B_d, T=8))
    # (b) auto-chosen T (single MXU-depth chunk at this toy length).
    out_auto = jax.block_until_ready(hippo_legt_forward(x, A_d, B_d))

    for name, out in (("T=8", out_small), ("auto-T", out_auto)):
        assert out.shape == (L, d0, d1, N), (name, out.shape)
        if not jnp.allclose(out, ref, rtol=2e-3, atol=2e-3):
            err = float(jnp.max(jnp.abs(out - ref)))
            raise AssertionError(f"{name}: mismatch vs reference, max abs err {err}")

    print("KERNEL_OK")
</pallas_src>

<mosaic_0001>
module attributes {stable_mosaic.version = 11 : i64} {
  func.func @kernel(%arg0: i32, %arg1: i32, %arg2: memref<8x256xf32, #tpu.memory_space<vmem>>, %arg3: memref<32x256xf32, #tpu.memory_space<vmem>>, %arg4: memref<32x32xf32, #tpu.memory_space<vmem>>, %arg5: memref<8x32xf32, #tpu.memory_space<vmem>>, %arg6: memref<1x8x8xf32, #tpu.memory_space<vmem>>, %arg7: memref<1x8x256xf32, #tpu.memory_space<vmem>>, %arg8: memref<8x32xf32, #tpu.memory_space<vmem>>) attributes {dimension_semantics = [#tpu.dimension_semantics<parallel>, #tpu.dimension_semantics<arbitrary>], iteration_bounds = array<i64: 1, 4>, scalar_prefetch = 0 : i64, scratch_operands = 1 : i64, tpu.core_type = #tpu.core_type<tc>, window_params = [{pipeline_mode = #tpu.pipeline_mode<synchronous>, transform_indices = @transform_0, window_bounds = array<i64: 8, 256>}, {pipeline_mode = #tpu.pipeline_mode<synchronous>, transform_indices = @transform_1, window_bounds = array<i64: 32, 256>}, {pipeline_mode = #tpu.pipeline_mode<synchronous>, transform_indices = @transform_2, window_bounds = array<i64: 32, 32>}, {pipeline_mode = #tpu.pipeline_mode<synchronous>, transform_indices = @transform_3, window_bounds = array<i64: 8, 32>}, {transform_indices = @transform_4, window_bounds = array<i64: 1, 8, 8>}, {transform_indices = @transform_5, window_bounds = array<i64: 1, 8, 256>}]} {
    %c0_i32 = arith.constant 0 : i32
    %0 = arith.cmpi eq, %arg1, %c0_i32 : i32
    %1 = arith.extui %0 : i1 to i32
    %c0_i32_0 = arith.constant 0 : i32
    %2 = arith.cmpi ne, %1, %c0_i32_0 : i32
    scf.if %2 {
      %cst_21 = arith.constant 0.000000e+00 : f32
      %20 = vector.broadcast %cst_21 : f32 to vector<8x32xf32>
      %c0_22 = arith.constant 0 : index
      %c0_23 = arith.constant 0 : index
      %21 = vector.load %arg8[%c0_22, %c0_23] : memref<8x32xf32, #tpu.memory_space<vmem>>, vector<8x32xf32>
      tpu.vector_store %arg8[%c0_22, %c0_23], %20 {strides = array<i32>} : memref<8x32xf32, #tpu.memory_space<vmem>>, vector<8x32xf32>,
    } else {
    }
    %c0 = arith.constant 0 : index
    %c0_1 = arith.constant 0 : index
    %c0_2 = arith.constant 0 : index
    %3 = vector.load %arg6[%c0, %c0_1, %c0_2] : memref<1x8x8xf32, #tpu.memory_space<vmem>>, vector<1x8x8xf32>
    %4 = vector.shape_cast %3 : vector<1x8x8xf32> to vector<8x8xf32>
    %c0_3 = arith.constant 0 : index
    %c0_4 = arith.constant 0 : index
    %5 = vector.load %arg8[%c0_3, %c0_4] : memref<8x32xf32, #tpu.memory_space<vmem>>, vector<8x32xf32>
    %c0_5 = arith.constant 0 : index
    %c0_6 = arith.constant 0 : index
    %6 = vector.load %arg2[%c0_5, %c0_6] : memref<8x256xf32, #tpu.memory_space<vmem>>, vector<8x256xf32>
    %cst = arith.constant dense<0.000000e+00> : vector<8x256xf32>
    %7 = tpu.matmul %4, %6, %cst {dimension_numbers = #tpu.dot_dimension_numbers<[1], [0], [0], [1], [0, 0, 1, 1], [], []>, precision = #tpu.contract_precision<fp32>} : vector<8x8xf32>, vector<8x256xf32>, vector<8x256xf32> -> vector<8x256xf32>
    %c0_7 = arith.constant 0 : index
    %c0_8 = arith.constant 0 : index
    %8 = vector.load %arg3[%c0_7, %c0_8] : memref<32x256xf32, #tpu.memory_space<vmem>>, vector<32x256xf32>
    %cst_9 = arith.constant dense<0.000000e+00> : vector<8x256xf32>
    %9 = tpu.matmul %5, %8, %cst_9 {dimension_numbers = #tpu.dot_dimension_numbers<[1], [0], [0], [1], [0, 0, 1, 1], [], []>, precision = #tpu.contract_precision<fp32>} : vector<8x32xf32>, vector<32x256xf32>, vector<8x256xf32> -> vector<8x256xf32>
    %10 = arith.addf %7, %9 : vector<8x256xf32>
    %c0_10 = arith.constant 0 : index
    %c0_11 = arith.constant 0 : index
    %c0_12 = arith.constant 0 : index
    %11 = vector.load %arg7[%c0_10, %c0_11, %c0_12] : memref<1x8x256xf32, #tpu.memory_space<vmem>>, vector<1x8x256xf32>
    %12 = vector.shape_cast %11 : vector<1x8x256xf32> to vector<8x256xf32>
    %13 = vector.shape_cast %10 : vector<8x256xf32> to vector<1x8x256xf32>
    tpu.vector_store %arg7[%c0_10, %c0_11, %c0_12], %13 {strides = array<i32>} : memref<1x8x256xf32, #tpu.memory_space<vmem>>, vector<1x8x256xf32>,
    %c0_13 = arith.constant 0 : index
    %c0_14 = arith.constant 0 : index
    %14 = vector.load %arg4[%c0_13, %c0_14] : memref<32x32xf32, #tpu.memory_space<vmem>>, vector<32x32xf32>
    %cst_15 = arith.constant dense<0.000000e+00> : vector<8x32xf32>
    %15 = tpu.matmul %5, %14, %cst_15 {dimension_numbers = #tpu.dot_dimension_numbers<[1], [0], [0], [1], [0, 0, 1, 1], [], []>, precision = #tpu.contract_precision<fp32>} : vector<8x32xf32>, vector<32x32xf32>, vector<8x32xf32> -> vector<8x32xf32>
    %c0_16 = arith.constant 0 : index
    %c0_17 = arith.constant 0 : index
    %16 = vector.load %arg5[%c0_16, %c0_17] : memref<8x32xf32, #tpu.memory_space<vmem>>, vector<8x32xf32>
    %cst_18 = arith.constant dense<0.000000e+00> : vector<8x32xf32>
    %17 = tpu.matmul %4, %16, %cst_18 {dimension_numbers = #tpu.dot_dimension_numbers<[1], [0], [0], [1], [0, 0, 1, 1], [], []>, precision = #tpu.contract_precision<fp32>} : vector<8x8xf32>, vector<8x32xf32>, vector<8x32xf32> -> vector<8x32xf32>
    %18 = arith.addf %15, %17 : vector<8x32xf32>
    %c0_19 = arith.constant 0 : index
    %c0_20 = arith.constant 0 : index
    %19 = vector.load %arg8[%c0_19, %c0_20] : memref<8x32xf32, #tpu.memory_space<vmem>>, vector<8x32xf32>
    tpu.vector_store %arg8[%c0_19, %c0_20], %18 {strides = array<i32>} : memref<8x32xf32, #tpu.memory_space<vmem>>, vector<8x32xf32>,
    return
  }
  func.func @transform_0(%arg0: i32, %arg1: i32) -> (i32, i32) {
    %c0_i32 = arith.constant 0 : i32
    %c0_i32_0 = arith.constant 0 : i32
    %c0_i32_1 = arith.constant 0 : i32
    return %c0_i32, %c0_i32_0 : i32, i32
  }
  func.func @transform_1(%arg0: i32, %arg1: i32) -> (i32, i32) {
    %c0_i32 = arith.constant 0 : i32
    %c0_i32_0 = arith.constant 0 : i32
    %c0_i32_1 = arith.constant 0 : i32
    return %c0_i32, %c0_i32_0 : i32, i32
  }
  func.func @transform_2(%arg0: i32, %arg1: i32) -> (i32, i32) {
    %c0_i32 = arith.constant 0 : i32
    %c0_i32_0 = arith.constant 0 : i32
    %c0_i32_1 = arith.constant 0 : i32
    return %c0_i32, %c0_i32_0 : i32, i32
  }
  func.func @transform_3(%arg0: i32, %arg1: i32) -> (i32, i32) {
    %c0_i32 = arith.constant 0 : i32
    %c0_i32_0 = arith.constant 0 : i32
    %c0_i32_1 = arith.constant 0 : i32
    return %c0_i32, %c0_i32_0 : i32, i32
  }
  func.func @transform_4(%arg0: i32, %arg1: i32) -> (i32, i32, i32) {
    %c0_i32 = arith.constant 0 : i32
    %c0_i32_0 = arith.constant 0 : i32
    return %arg1, %arg0, %c0_i32 : i32, i32, i32
  }
  func.func @transform_5(%arg0: i32, %arg1: i32) -> (i32, i32, i32) {
    %c0_i32 = arith.constant 0 : i32
    %c0_i32_0 = arith.constant 0 : i32
    return %arg1, %arg0, %c0_i32 : i32, i32, i32
  }
}

</mosaic_0001>

<bundles_post_ra>
// kernel: tpu_custom_call.1
= control target key start
LH: loop header
LB: loop body
LE: loop exit
PB: predicated region body
PF: predicated region fallthrough
CT: control target
= control target key end

     0   :  { %s2240_s0 = inlined_call_operand.hbm [shape: f32[8,256], index: 0, kind: input, shape index: {}]   ;;  %s2241_s1 = inlined_call_operand.hbm [shape: f32[32,256], index: 1, kind: input, shape index: {}]   ;;  %s2242_s2 = inlined_call_operand.hbm [shape: f32[32,32], index: 2, kind: input, shape index: {}]   ;;  %s2243_s3 = inlined_call_operand.hbm [shape: f32[8,32], index: 3, kind: input, shape index: {}]   ;;  %s2244_s4 = inlined_call_operand.hbm [shape: f32[4,8,8], index: 4, kind: input, shape index: {}]   ;;  %s2245_s5 = inlined_call_operand.hbm [shape: f32[4,8,256], index: 5, kind: output, shape index: {}]  }
   0x1   :  { %2246 = sst [smem:[#allocation18_spill]] %s2240_s0 }
   0x2   :  { %10 = vsyncpa [#allocation4], 0 }
   0x3   :  { %11 = vsyncpa [#allocation7], 0 }
   0x4   :  { %12 = vsyncpa [#allocation10], 0 }
   0x5   :  { %13 = vsyncpa [#allocation5], 0 }
   0x6   :  { %15 = vsyncpa [#allocation5 + $0x1], 0  ;;  %s1902_s18 = smov 0   ;;  %s1904_s19 = smov 0  }
   0x7   :  { %s1906_s20 = smov 0   ;;  %s1908_s21 = smov 0  }
   0x8   :  { %s1910_s22 = smov 0   ;;  %s1912_s23 = smov 0  }
   0x9 LB: > { %s1933_s24 = sadd.s32 4294967295, %s1861_s23   ;;  %p1487_p0 = scmp.ge.s32.totalorder %s1861_s23, 1  ;;  %s1861_s23 = sphi %s1912_s23, %s21_s23   ;;  %s1857_s22 = sphi %s1910_s22, %s2258_s22   ;;  %s1853_s21 = sphi %s1908_s21, %s2257_s21   ;;  %s1849_s20 = sphi %s1906_s20, %s2256_s20   ;;  %s1845_s19 = sphi %s1904_s19, %s2255_s19   ;;  %s1841_s18 = sphi %s1902_s18, %s2254_s18  }
   0xa   : > { %p140_p1 = scmp.eq.s32.totalorder %s1933_s24, 0  ;;  %p165_p2 = scmp.eq.s32.totalorder %s1933_s24, 3 }
   0xb   : > { %p178_p3 = scmp.lt.s32.totalorder %s1861_s23, 5  ;;  %s2247_s0 = sld [smem:[#allocation18_spill]] }
   0xc   : > { %s1863_s29 = smov [#allocation3]   ;;  %s201_s8 = sshll.u32 %s2241_s1, 4  ;;  %s202_s8 = int_to_ptr.hbm [resolvable:$true] %s201_s8 }
   0xd   : > { %p1942_p4 = pnand %p1487_p0, %p178_p3  ;;  %s192_s30 = sshll.u32 %s1863_s29, 4  ;;  %s193_s30 = int_to_ptr.vmem [resolvable:$true] %s192_s30 }
   0xe   : > { %s1864_s10 = smov [#allocation6]   ;;  %s215_s14 = sshll.u32 %s2242_s2, 4  ;;  %s216_s14 = int_to_ptr.hbm [resolvable:$true] %s215_s14 }
   0xf   : > { %p1529_p5 = pneg %p1942_p4  ;;  %s203_s11 = sshll.u32 %s1864_s10, 4  ;;  %s204_s11 = int_to_ptr.vmem [resolvable:$true] %s203_s11 }
  0x10   : > { %s1865_s15 = smov 256   ;;  %s1866_s16 = smov 16  }
  0x11   : > { %s190_s27 = sshll.u32 %s2247_s0, 4  ;;  %p1953_p6 = pnand %p1529_p5, %p140_p1  ;;  %s191_s27 = int_to_ptr.hbm [resolvable:$true] %s190_s27 }
  0x12   : > { %s1867_s17 = smov [#allocation8]   ;;  %s1868_s26 = smov 128  }
  0x13   : > { %1532 = dma.hbm_to_vmem [thread:$0]  (!%p1953_p6), %s191_s27, 256, %s193_s30, [#allocation4]  }
  0x14   : > { %1535 = dma.hbm_to_vmem [thread:$0]  (!%p1953_p6), %s202_s8, 1024, %s204_s11, [#allocation7], %s1865_s15, %s1865_s15, %s1866_s16  }
  0x15   : > { %s217_s25 = sshll.u32 %s1867_s17, 4  ;;  %s1869_s27 = smov 8   ;;  %s218_s25 = int_to_ptr.vmem [resolvable:$true] %s217_s25 }
  0x16   : > { %1538 = dma.hbm_to_vmem [thread:$0]  (!%p1953_p6), %s216_s14, 512, %s218_s25, [#allocation7], %s1868_s26, %s1868_s26, %s1869_s27  }
  0x17   : > { %s230_s6 = sshll.u32 %s2243_s3, 4  ;;  %s1870_s7 = smov [#allocation9]   ;;  %s231_s6 = int_to_ptr.hbm [resolvable:$true] %s230_s6 }
  0x18   : > { %s232_s8 = sshll.u32 %s1870_s7, 4  ;;  %s1486_s10 = sadd.s32 4294967294, %s1861_s23   ;;  %s233_s8 = int_to_ptr.vmem [resolvable:$true] %s232_s8 }
  0x19   : > { %1541 = dma.hbm_to_vmem [thread:$0]  (!%p1953_p6), %s231_s6, 128, %s233_s8, [#allocation10]  }
  0x1a   : > { %s30_s11 = sadd.s32 1, %s1857_s22  ;;  %s126_s12 = sadd.s32 1, %s1849_s20 }
  0x1b   : > { %p31_p7 = scmp.ge.s32.totalorder %s30_s11, 4  ;;  %p133_p8 = scmp.ne.s32.totalorder %s1849_s20, %s1845_s19 }
  0x1c   : > { %p134_p9 = scmp.eq.s32.totalorder %s1861_s23, 0  ;;  %p139_p10 = scmp.ne.s32.totalorder %s1845_s19, %s1841_s18 }
  0x1d   : > { %s2260_s11 = smov (%p31_p7, %s30_s11), 0  ;;  %p1995_p13 = por %p165_p2, %p133_p8 }
  0x1e   : > { %p1981_p11 = por %p134_p9, %p133_p8  ;;  %p1987_p12 = por %p140_p1, %p139_p10 }
  0x1f   : > { %s121_s14 = ssub.s32 %s1857_s22, %s2260_s11  ;;  %p171_p3 = scmp.eq.s32.totalorder %s1486_s10, 3 }
  0x20   : > { %p124_p0 = scmp.eq.s32.totalorder %s121_s14, 0  ;;  %p1554_p5 = scmp.lt.s32.totalorder %s1861_s23, 4 }
  0x21   : > { %s243_s16 = sand.u32 1, %s1861_s23   ;;  %p2004_p6 = por %p171_p3, %p139_p10 }
  0x22   : > { %s2002_s17 = scalar_select %p124_p0, %s1849_s20, %s126_s12  }
  0x23   : > { %s245_s26 = sand.u32 1, %s1849_s20   ;;  %s1494_s27 = sshll.u32 %s1857_s22, 3 }
  0x24   : > { %s1493_s29 = sshll.u32 %s245_s26, 3  ;;  %s252_s7 = scalar_lea.hbm %s2244_s4, %s1494_s27 }
  0x25   : > { %s254_s8 = sshll.u32 %s252_s7, 4  ;;  %s247_s0 = scalar_lea.vmem [#allocation11], %s1493_s29  ;;  %s255_s8 = int_to_ptr.hbm [resolvable:$true] %s254_s8 }
  0x26   : > { %s256_s14 = sshll.u32 %s247_s0, 4  ;;  %p1543_p2 = pnand %p1554_p5, %p1981_p11  ;;  %s257_s14 = int_to_ptr.vmem [resolvable:$true] %s256_s14 }
  0x27   : > { %s244_s10 = scalar_lea.sflag [#allocation4], %s243_s16  ;;  %265 = sbr.rel (%p1942_p4) target bundleno = 281 (0x119), region = 40 }
  0x28   : > { %1545 = dma.hbm_to_vmem [thread:$0]  (!%p1543_p2), %s255_s8, 128, %s257_s14, %s244_s10  }
  0x2c   : > { %1820 = dma.done.wait (%p140_p1), [#allocation4], 256  }
  0x2d   : > { %1822 = vsyncadd (%p140_p1), [#allocation4], 4294967040 }
  0x2e   : > { %1824 = dma.done.wait (%p140_p1), [#allocation7], 1536  }
  0x2f   : > { %1826 = vsyncadd (%p140_p1), [#allocation7], 4294965760 }
  0x30   : > { %1828 = dma.done.wait (%p140_p1), [#allocation10], 128  }
  0x31   : > { %1830 = vsyncadd (%p140_p1), [#allocation10], 4294967168  ;;  %s287_s0 = sand.u32 1, %s1933_s24   ;;  %s2033_s28 = sand.u32 1, %s1845_s19  }
  0x32   : > { %s1500_s12 = sshll.u32 %s2033_s28, 3  ;;  %s288_s13 = scalar_lea.sflag [#allocation4], %s287_s0 }
  0x33   : > { %s2036_s16 = scalar_lea.vmem [#allocation11], %s1500_s12 }
  0x34   : > { %1832 = dma.done.wait (%p1987_p12), %s288_s13, 128  }
  0x35   : > { %1834 = vsyncadd (%p1987_p12), %s288_s13, 4294967168  ;;  %s1501_s26 = sshll.u32 %s2033_s28, 4  ;;  %p1502_p1 = scmp.ne.s32.totalorder %s1853_s21, 0 }
  0x36   : > { %s2043_s27 = scalar_lea.vmem [#allocation12], %s1501_s26 }
  0x37   : > { %322 = sbr.rel (%p1502_p1) target bundleno = 62 (0x3e), region = 64 }
  0x3c   : > { %vm323_vm0 = vcmask 261120   ;;  %v1871_v0 = vmov 0.0  }
  0x3d   : > { %324 = vst.msk [vmem:[#allocation2] sm:$0xff] %vm323_vm0, %v1871_v0 }
  0x3e PF: > { %v335_v1 = vld [vmem:[#allocation6 + $0x30] sm:$0xff]  ;;  %v333_v2 = vld [vmem:[#allocation6 + $0x20] sm:$0xff]  ;;  %vm337_vm1 = vcmask 261120   ;;  %v336_v9 = vld [vmem:[#allocation6 + $0x38] sm:$0xff]  ;;  %vm711_vm2 = vcmask 64512   ;;  %s1508_s24 = sshll.u32 %s1853_s21, 4 }
  0x3f   : > { %v331_v3 = vld [vmem:[#allocation6 + $0x10] sm:$0xff]  ;;  %v2046_v4 = vand.u32 4294901760, %v335_v1  ;;  %v2048_v5 = vand.u32 4294901760, %v333_v2  ;;  %v329_v7 = vld [vmem:[#allocation6] sm:$0xff]  ;;  %v2055_v12 = vand.u32 4294901760, %v336_v9  ;;  %v334_v13 = vld [vmem:[#allocation6 + $0x28] sm:$0xff]  ;;  %s1360_s30 = scalar_lea.hbm %s2245_s5, %s1508_s24 }
  0x40   : > { %v2050_v6 = vand.u32 4294901760, %v331_v3  ;;  %v2052_v10 = vand.u32 4294901760, %v329_v7  ;;  %v332_v14 = vld [vmem:[#allocation6 + $0x18] sm:$0xff]  ;;  %v330_v19 = vld [vmem:[#allocation6 + $0x8] sm:$0xff]  ;;  %v2067_v21 = vand.u32 4294901760, %v334_v13  ;;  %v327_v54 = vld [vmem:[#allocation3] sm:$0xff] }
  0x41   : > { %354 = vmatpush.msra.mxu0 %v2046_v4  ;;  %v383_v15 = vsub.f32 %v335_v1, %v2046_v4  ;;  %v389_v16 = vsub.f32 %v333_v2, %v2048_v5  ;;  %454 = vmatpush.msra.mxu3 %v2046_v4  ;;  %v2070_v22 = vsub.f32 %v336_v9, %v2055_v12  ;;  %v2072_v23 = vand.u32 4294901760, %v332_v14  ;;  %v325_v53 = vld [vmem:[%s2036_s16] sm:$0xff]  ;;  %v328_v56 = vld [vmem:[#allocation3 + $0x8] sm:$0xff]  ;;  %s1362_s6 = sshll.u32 %s2043_s27, 4  ;;  %s1364_s7 = sshll.u32 %s1360_s30, 4  ;;  %s1363_s6 = int_to_ptr.vmem [resolvable:$true] %s1362_s6  ;;  %s1365_s7 = int_to_ptr.hbm [resolvable:$true] %s1364_s7 }
  0x42   : > { %v395_v17 = vsub.f32 %v331_v3, %v2050_v6  ;;  %v2065_v20 = vsub.f32 %v329_v7, %v2052_v10  ;;  %v2082_v30 = vsub.f32 %v334_v13, %v2067_v21  ;;  %v2084_v31 = vand.u32 4294901760, %v330_v19  ;;  %v1013_v7 = vld [vmem:[#allocation9] sm:$0xff]  ;;  %v1012_v13 = vld [vmem:[#allocation8 + $0x18] sm:$0xff]  ;;  %s1347_s21 = scalar_lea.sflag [#allocation5], %s2033_s28  ;;  %s1781_s8 = sshra.s32 %s1365_s7, 4  ;;  %s1782_s8 = int_to_ptr.hbm [resolvable:$true] %s1781_s8 }
  0x43   : > { %425 = vmatpush.msra.mxu2 %v383_v15  ;;  %356 = vmatpush.msra.mxu0 %v2048_v5  ;;  %v384_v24 = vand.u32 4294901760, %v383_v15  ;;  %v390_v26 = vand.u32 4294901760, %v389_v16  ;;  %v569_v28 = vand.u32 4294901760, %v2070_v22  ;;  %v2096_v38 = vsub.f32 %v332_v14, %v2072_v23  ;;  %s1783_s14 = scalar_lea.hbm %s1782_s8, 16  ;;  %s1787_s12 = scalar_lea.hbm %s2245_s5, 64 }
  0x44   : > { %v326_v8 = vld [vmem:[#allocation2] sm:$0xff]  ;;  %v396_v27 = vand.u32 4294901760, %v395_v17  ;;  %456 = vmatpush.msra.mxu3 %v2048_v5  ;;  %v402_v29 = vand.u32 4294901760, %v2065_v20  ;;  %v575_v37 = vand.u32 4294901760, %v2082_v30  ;;  %v586_v48 = vsub.f32 %v330_v19, %v2084_v31  ;;  %p1784_p4 = scmp.ne.s32.totalorder %s1782_s8, %s1783_s14  ;;  %p1788_p9 = scmp.lt.s32.totalorder %s1782_s8, %s2245_s5 }
  0x45   : > { %v339_v11 = vsel %vm337_vm1, %v326_v8, 0  ;;  %428 = vmatpush.msra.mxu2 %v389_v16  ;;  %358 = vmatpush.msra.mxu0 %v2050_v6  ;;  %v385_v32 = vsub.f32 %v383_v15, %v384_v24  ;;  %v391_v34 = vsub.f32 %v389_v16, %v390_v26  ;;  %v570_v36 = vsub.f32 %v2070_v22, %v569_v28  ;;  %v1011_v15 = vld [vmem:[#allocation8 + $0x10] sm:$0xff]  ;;  %p1789_p10 = scmp.lt.s32.totalorder %s1787_s12, %s1783_s14 }
  0x46   : > { %v2062_v18 = vand.u32 4294901760, %v339_v11  ;;  %v397_v35 = vsub.f32 %v395_v17, %v396_v27  ;;  %458 = vmatpush.msra.mxu3 %v2050_v6  ;;  %v403_v42 = vsub.f32 %v2065_v20, %v402_v29  ;;  %v576_v43 = vsub.f32 %v2082_v30, %v575_v37  ;;  %p1785_p7 = pnand %p1784_p4, %p1995_p13 }
  0x47   : > { %431 = vmatpush.msra.mxu2 %v395_v17  ;;  %360 = vmatpush.msra.mxu0 %v2052_v10  ;;  %v386_v39 = vand.u32 4294901760, %v385_v32  ;;  %v392_v41 = vand.u32 4294901760, %v391_v34  ;;  %v581_v44 = vand.u32 4294901760, %v2096_v38  ;;  %v571_v47 = vand.u32 4294901760, %v570_v36  ;;  %v1010_v17 = vld [vmem:[#allocation8 + $0x8] sm:$0xff]  ;;  %p1790_p11 = por %p1789_p10, %p1788_p9 }
  0x48   : > { %v2076_v25 = vsub.f32 %v339_v11, %v2062_v18  ;;  %460 = vmatpush.msra.mxu3 %v2052_v10  ;;  %v398_v46 = vand.u32 4294901760, %v397_v35  ;;  %v404_v50 = vand.u32 4294901760, %v403_v42  ;;  %v577_v51 = vand.u32 4294901760, %v576_v43  ;;  %p1786_p8 = pneg %p1785_p7 }
  0x49   : > { %483 = vmatpush.msrb.mxu0 %v384_v24  ;;  %387 = vmatpush.msra.mxu1 %v386_v39  ;;  %v582_v49 = vsub.f32 %v2096_v38, %v581_v44  ;;  %v587_v52 = vand.u32 4294901760, %v586_v48  ;;  %v713_v58 = vsel %vm711_vm2, %v325_v53, 0  ;;  %v730_v59 = vand.u32 4294901760, %v327_v54 }
  0x4a   : > { %v2088_v33 = vand.u32 4294901760, %v2076_v25  ;;  %434 = vmatpush.msra.mxu2 %v2065_v20  ;;  %572 = vmatpush.msrb.mxu3 %v571_v47  ;;  %v2118_v61 = vand.u32 4294901760, %v328_v56  ;;  %v2121_v62 = vand.u32 4294901760, %v713_v58  ;;  %v2161_v16 = vand.u32 4294901760, %v1012_v13  ;;  %p1791_p12 = pnand %p1790_p11, %p1786_p8 }
  0x4b   : > { %437 = vmatmul.f32.vlgmr.msra.gmra.mxu2 %v2076_v25  ;;  %393 = vmatpush.msra.mxu1 %v392_v41  ;;  %v588_v55 = vsub.f32 %v586_v48, %v587_v52  ;;  %v583_v57 = vand.u32 4294901760, %v582_v49  ;;  %v757_v63 = vsub.f32 %v327_v54, %v730_v59  ;;  %v2164_v19 = vand.u32 4294901760, %v1011_v15 }
  0x4c   : > { %v364_v40 = vsub.f32 %v2076_v25, %v2088_v33  ;;  %464 = vmatmul.f32.vlgmr.msra.gmra.mxu3 %v2088_v33  ;;  %539 = vmatpush.msrb.mxu2 %v2055_v12  ;;  %v903_v0 = vsub.f32 %v328_v56, %v2118_v61  ;;  %v2132_v1 = vsub.f32 %v713_v58, %v2121_v62 }
  0x4d   : > { %487 = vmatpush.msrb.mxu0 %v390_v26  ;;  %399 = vmatpush.msra.mxu1 %v398_v46  ;;  %v589_v60 = vand.u32 4294901760, %v588_v55  ;;  %v758_v2 = vand.u32 4294901760, %v757_v63  ;;  %v1208_v24 = vsub.f32 %v1011_v15, %v2164_v19 }
  0x4e   : > { %v2106_v45 = vand.u32 4294901760, %v364_v40  ;;  %541 = vmatpush.msrb.mxu2 %v2067_v21  ;;  %578 = vmatpush.msrb.mxu3 %v577_v51  ;;  %v904_v3 = vand.u32 4294901760, %v903_v0 }
  0x4f   : > { %491 = vmatpush.msrb.mxu0 %v396_v27  ;;  %405 = vmatpush.msra.mxu1 %v404_v50 }
  0x50   : > { %366 = vmatmul.f32.vlgmr.msra.gmra.mxu0 %v2106_v45  ;;  %543 = vmatpush.msrb.mxu2 %v2072_v23 }
  0x51   : > { %407 = vmatmul.f32.vlgmr.msra.gmra.mxu1 %v2062_v18  ;;  %495 = vmatpush.msrb.mxu0 %v402_v29 }
  0x52   : > { %514 = vmatpush.msrb.mxu1 %v2046_v4  ;;  %545 = vmatpush.msrb.mxu2 %v2084_v31  ;;  %v2141_v4 = vand.u32 4294901760, %v2132_v1 }
  0x53   : > { %584 = vmatpush.msrb.mxu3 %v583_v57  ;;  %551 = vmatmul.f32.vlgmr.msrb.gmra.mxu2 %v2106_v45 }
  0x54   : > { %516 = vmatpush.msrb.mxu1 %v2048_v5  ;;  %610 = vmatpush.msra.mxu0 %v2070_v22  ;;  %v759_v5 = vsub.f32 %v757_v63, %v758_v2  ;;  %v735_v8 = vsub.f32 %v2132_v1, %v2141_v4  ;;  %v1202_v22 = vsub.f32 %v1012_v13, %v2161_v16 }
  0x55   : > { %590 = vmatpush.msrb.mxu3 %v589_v60  ;;  %668 = vmatpush.msra.mxu2 %v569_v28 }
  0x56   : > { %518 = vmatpush.msrb.mxu1 %v2050_v6  ;;  %592 = vmatmul.f32.vlgmr.msrb.gmra.mxu3 %v2062_v18  ;;  %v905_v6 = vsub.f32 %v903_v0, %v904_v3  ;;  %v760_v9 = vand.u32 4294901760, %v759_v5  ;;  %v1203_v28 = vand.u32 4294901760, %v1202_v22 }
  0x57   : > { %613 = vmatpush.msra.mxu0 %v2082_v30  ;;  %672 = vmatpush.msra.mxu2 %v575_v37  ;;  %v1209_v30 = vand.u32 4294901760, %v1208_v24 }
  0x58   : > { %497 = vmatmul.f32.vlgmr.msrb.gmra.mxu0 %v2062_v18  ;;  %699 = vmatpush.msra.mxu3 %v2055_v12  ;;  %v906_v11 = vand.u32 4294901760, %v905_v6  ;;  %v1204_v34 = vsub.f32 %v1202_v22, %v1203_v28 }
  0x59   : > { %520 = vmatpush.msrb.mxu1 %v2052_v10  ;;  %616 = vmatpush.msra.mxu0 %v2096_v38  ;;  %v2155_v10 = vand.u32 4294901760, %v1013_v7  ;;  %v1210_v36 = vsub.f32 %v1208_v24, %v1209_v30 }
  0x5a   : > { %676 = vmatpush.msra.mxu2 %v581_v44  ;;  %701 = vmatpush.msra.mxu3 %v2067_v21  ;;  %v1205_v38 = vand.u32 4294901760, %v1204_v34 }
  0x5b   : > { %522 = vmatmul.f32.vlgmr.msrb.gmra.mxu1 %v2062_v18  ;;  %619 = vmatpush.msra.mxu0 %v586_v48  ;;  %v1056_v14 = vsub.f32 %v1013_v7, %v2155_v10  ;;  %v1211_v40 = vand.u32 4294901760, %v1210_v36 }
  0x5c   : > { %639 = vmatpush.msra.mxu1 %v2055_v12  ;;  %680 = vmatpush.msra.mxu2 %v587_v52  ;;  %v736_v12 = vand.u32 4294901760, %v735_v8 }
  0x5d   : > { %703 = vmatpush.msra.mxu3 %v2072_v23  ;;  %682 = vmatmul.f32.vlgmr.msra.gmra.mxu2 %v2062_v18  ;;  %v1057_v20 = vand.u32 4294901760, %v1056_v14 }
  0x5e   : > { %641 = vmatpush.msra.mxu1 %v2067_v21  ;;  %784 = vmatpush.msrb.mxu2 %v757_v63  ;;  %v1009_v21 = vld [vmem:[#allocation8] sm:$0xff] }
  0x5f   : > { %705 = vmatpush.msra.mxu3 %v2084_v31  ;;  %731 = vmatpush.msrb.mxu0 %v730_v59  ;;  %v1178_v26 = vand.u32 4294901760, %v1009_v21  ;;  %v1058_v27 = vsub.f32 %v1056_v14, %v1057_v20 }
  0x60   : > { %622 = vmatmul.f32.vlgmr.msra.gmra.mxu0 %v2076_v25  ;;  %643 = vmatpush.msra.mxu1 %v2072_v23  ;;  %v1176_v23 = vand.u32 4294901760, %v1010_v17 }
  0x61   : > { %707 = vmatmul.f32.vlgmr.msra.gmra.mxu3 %v2062_v18  ;;  %877 = vmatpush.msra.mxu2 %v2118_v61  ;;  %v1059_v32 = vand.u32 4294901760, %v1058_v27 }
  0x62   : > { %645 = vmatpush.msra.mxu1 %v2084_v31  ;;  %807 = vmatpush.msrb.mxu3 %v730_v59  ;;  %v1214_v29 = vsub.f32 %v1010_v17, %v1176_v23  ;;  %v1220_v31 = vsub.f32 %v1009_v21, %v1178_v26 }
  0x63   : > { %649 = vmatmul.f32.vlgmr.msra.gmra.mxu1 %v2088_v33  ;;  %833 = vmatpush.msra.mxu0 %v758_v2 }
  0x64   : > { %761 = vmatpush.msrb.mxu1 %v760_v9  ;;  %907 = vmatpush.msra.mxu3 %v906_v11  ;;  %v1215_v35 = vand.u32 4294901760, %v1214_v29  ;;  %v1221_v37 = vand.u32 4294901760, %v1220_v31 }
  0x65   : > { %787 = vmatmul.f32.vlgmr.msrb.gmra.mxu2 %v2132_v1 }
  0x66   : > { %855 = vmatpush.msra.mxu1 %v730_v59  ;;  %979 = vmatpush.msrb.mxu2 %v904_v3  ;;  %v1216_v39 = vsub.f32 %v1214_v29, %v1215_v35  ;;  %v1222_v41 = vsub.f32 %v1220_v31, %v1221_v37 }
  0x68   : > { %737 = vmatmul.f32.vlgmr.msrb.gmra.mxu0 %v736_v12  ;;  %v1217_v42 = vand.u32 4294901760, %v1216_v39  ;;  %v1223_v43 = vand.u32 4294901760, %v1222_v41 }
  0x69   : > { %930 = vmatpush.msrb.mxu0 %v903_v0  ;;  %811 = vmatmul.f32.vlgmr.msrb.gmra.mxu3 %v2141_v4 }
  0x6a   : > { %1001 = vmatpush.msrb.mxu3 %v2118_v61 }
  0x6b   : > { %763 = vmatmul.f32.vlgmr.msrb.gmra.mxu1 %v2121_v62 }
  0x6c   : > { %953 = vmatpush.msrb.mxu1 %v2118_v61 }
  0x6d   : > { %883 = vmatmul.f32.vlgmr.msra.gmra.mxu2 %v736_v12 }
  0x6e   : > { %1083 = vmatpush.msra.mxu2 %v1056_v14 }
  0x70   : > { %835 = vmatmul.f32.vlgmr.msra.gmra.mxu0 %v2121_v62 }
  0x71   : > { %1030 = vmatpush.msra.mxu0 %v2155_v10  ;;  %909 = vmatmul.f32.vlgmr.msra.gmra.mxu3 %v2121_v62 }
  0x72   : > { %1106 = vmatpush.msra.mxu3 %v2155_v10 }
  0x73   : > { %857 = vmatmul.f32.vlgmr.msra.gmra.mxu1 %v2121_v62 }
  0x74   : > { %1060 = vmatpush.msra.mxu1 %v1059_v32 }
  0x75   : > { %981 = vmatmul.f32.vlgmr.msrb.gmra.mxu2 %v2121_v62 }
  0x76   : > { %1173 = vmatpush.msrb.mxu2 %v2161_v16 }
  0x78   : > { %933 = vmatmul.f32.vlgmr.msrb.gmra.mxu0 %v2132_v1  ;;  %1175 = vmatpush.msrb.mxu2 %v2164_v19 }
  0x79   : > { %1132 = vmatpush.msrb.mxu0 %v1057_v20  ;;  %1003 = vmatmul.f32.vlgmr.msrb.gmra.mxu3 %v2121_v62 }
  0x7a   : > { %1206 = vmatpush.msrb.mxu3 %v1205_v38  ;;  %1177 = vmatpush.msrb.mxu2 %v1176_v23 }
  0x7b   : > { %957 = vmatmul.f32.vlgmr.msrb.gmra.mxu1 %v2141_v4 }
  0x7c   : > { %1212 = vmatpush.msrb.mxu3 %v1211_v40  ;;  %1154 = vmatpush.msrb.mxu1 %v2155_v10 }
  0x7d   : > { %1179 = vmatpush.msrb.mxu2 %v1178_v26 }
  0x7e   : > { %1218 = vmatpush.msrb.mxu3 %v1217_v42  ;;  %1086 = vmatmul.f32.vlgmr.msra.gmra.mxu2 %v2132_v1 }
  0x7f   : > { %1302 = vmatpush.msra.mxu2 %v1203_v28 }
  0x80   : > { %1036 = vmatmul.f32.vlgmr.msra.gmra.mxu0 %v736_v12  ;;  %1224 = vmatpush.msrb.mxu3 %v1223_v43 }
  0x81   : > { %1110 = vmatmul.f32.vlgmr.msra.gmra.mxu3 %v2141_v4  ;;  %1244 = vmatpush.msra.mxu0 %v1202_v22 }
  0x82   : > { %1333 = vmatpush.msra.mxu3 %v2161_v16  ;;  %1306 = vmatpush.msra.mxu2 %v1209_v30 }
  0x83   : > { %1062 = vmatmul.f32.vlgmr.msra.gmra.mxu1 %v2121_v62  ;;  %1247 = vmatpush.msra.mxu0 %v1208_v24 }
  0x84   : > { %1273 = vmatpush.msra.mxu1 %v2161_v16  ;;  %1310 = vmatpush.msra.mxu2 %v1215_v35 }
  0x85   : > { %1335 = vmatpush.msra.mxu3 %v2164_v19  ;;  %1250 = vmatpush.msra.mxu0 %v1214_v29 }
  0x86   : > { %1275 = vmatpush.msra.mxu1 %v2164_v19  ;;  %1185 = vmatmul.f32.vlgmr.msrb.gmra.mxu2 %v2106_v45 }
  0x87   : > { %1337 = vmatpush.msra.mxu3 %v1176_v23  ;;  %1314 = vmatpush.msra.mxu2 %v1221_v37 }
  0x88   : > { %1134 = vmatmul.f32.vlgmr.msrb.gmra.mxu0 %v2121_v62  ;;  %1277 = vmatpush.msra.mxu1 %v1176_v23 }
  0x89   : > { %1226 = vmatmul.f32.vlgmr.msrb.gmra.mxu3 %v2062_v18  ;;  %1253 = vmatpush.msra.mxu0 %v1220_v31 }
  0x8a   : > { %1339 = vmatpush.msra.mxu3 %v1178_v26  ;;  %1279 = vmatpush.msra.mxu1 %v1178_v26 }
  0x8b   : > { %1156 = vmatmul.f32.vlgmr.msrb.gmra.mxu1 %v2121_v62 }
  0x8e   : > { %1316 = vmatmul.f32.vlgmr.msra.gmra.mxu2 %v2062_v18 }
  0x90   : > { %1256 = vmatmul.f32.vlgmr.msra.gmra.mxu0 %v2076_v25 }
  0x91   : > { %1341 = vmatmul.f32.vlgmr.msra.gmra.mxu3 %v2062_v18 }
  0x93   : > { %1283 = vmatmul.f32.vlgmr.msra.gmra.mxu1 %v2088_v33 }
  0xcd   : > { %v367_v44 = vpop.f32.mrf.mxu0 }
  0xce   : > { %v408_v45 = vpop.f32.mrf.mxu1  ;;  %v438_v46 = vpop.f32.mrf.mxu2 }
  0xcf   : > { %v465_v47 = vpop.f32.mrf.mxu3  ;;  %v409_v49 = vadd.f32 %v408_v45, %v367_v44 }
  0xd1   : > { %v439_v52 = vadd.f32 %v438_v46, %v409_v49 }
  0xd3   : > { %v466_v55 = vadd.f32 %v465_v47, %v439_v52 }
  0xd5   : > { %v498_v48 = vpop.f32.mrf.mxu0 }
  0xd6   : > { %v552_v51 = vpop.f32.mrf.mxu2  ;;  %v499_v25 = vadd.f32 %v498_v48, %v466_v55 }
  0xd8   : > { %v523_v50 = vpop.f32.mrf.mxu1 }
  0xd9   : > { %v593_v53 = vpop.f32.mrf.mxu3  ;;  %v524_v60 = vadd.f32 %v523_v50, %v499_v25 }
  0xda   : > { %v594_v58 = vadd.f32 %v593_v53, %v552_v51 }
  0xdd   : > { %v623_v54 = vpop.f32.mrf.mxu0 }
  0xde   : > { %v624_v33 = vadd.f32 %v623_v54, %v594_v58 }
  0xe0   : > { %v650_v56 = vpop.f32.mrf.mxu1  ;;  %v683_v57 = vpop.f32.mrf.mxu2 }
  0xe1   : > { %v651_v63 = vadd.f32 %v650_v56, %v624_v33 }
  0xe3   : > { %v684_v5 = vadd.f32 %v683_v57, %v651_v63 }
  0xe4   : > { %v708_v59 = vpop.f32.mrf.mxu3 }
  0xe5   : > { %v738_v18 = vpop.f32.mrf.mxu0  ;;  %v709_v9 = vadd.f32 %v708_v59, %v684_v5 }
  0xe6   : > { %v739_v61 = vadd.f32 %v738_v18, %v524_v60 }
  0xe8   : > { %v764_v62 = vpop.f32.mrf.mxu1  ;;  %v788_v1 = vpop.f32.mrf.mxu2 }
  0xe9   : > { %v765_v0 = vadd.f32 %v764_v62, %v739_v61 }
  0xeb   : > { %v789_v2 = vadd.f32 %v788_v1, %v765_v0 }
  0xec   : > { %v812_v3 = vpop.f32.mrf.mxu3 }
  0xed   : > { %v836_v4 = vpop.f32.mrf.mxu0  ;;  %v813_v6 = vadd.f32 %v812_v3, %v789_v2 }
  0xef   : > { %v837_v7 = vadd.f32 %v836_v4, %v813_v6 }
  0xf0   : > { %v858_v8 = vpop.f32.mrf.mxu1  ;;  %v884_v11 = vpop.f32.mrf.mxu2 }
  0xf1   : > { %v859_v10 = vadd.f32 %v858_v8, %v837_v7  ;;  %v885_v12 = vadd.f32 %v884_v11, %v709_v9 }
  0xf3   : > { %1007 = vst [vmem:[%s2043_s27] sm:$0xff] %v859_v10 }
  0xf4   : > { %v910_v13 = vpop.f32.mrf.mxu3 }
  0xf5   : > { %v934_v14 = vpop.f32.mrf.mxu0  ;;  %v911_v15 = vadd.f32 %v910_v13, %v885_v12 }
  0xf7   : > { %v935_v16 = vadd.f32 %v934_v14, %v911_v15 }
  0xf8   : > { %v958_v17 = vpop.f32.mrf.mxu1  ;;  %v982_v20 = vpop.f32.mrf.mxu2 }
  0xf9   : > { %v959_v19 = vadd.f32 %v958_v17, %v935_v16 }
  0xfb   : > { %v983_v21 = vadd.f32 %v982_v20, %v959_v19 }
  0xfc   : > { %v1004_v22 = vpop.f32.mrf.mxu3 }
  0xfd   : > { %v1037_v23 = vpop.f32.mrf.mxu0  ;;  %v1005_v24 = vadd.f32 %v1004_v22, %v983_v21 }
  0xff   : > { %1008 = vst [vmem:[%s2043_s27 + $0x8] sm:$0xff] %v1005_v24 }
 0x100   : > { %v1063_v26 = vpop.f32.mrf.mxu1 }
 0x101   : > { %1794 = shalt.err (!%p1791_p12)
}
 0x102   : > { %1527 = dma.vmem_to_hbm [thread:$0]  (%p1995_p13), %s1363_s6, 256, %s1365_s7, %s1347_s21   ;;  %v1064_v27 = vadd.f32 %v1063_v26, %v1037_v23  ;;  %v1087_v28 = vpop.f32.mrf.mxu2 }
 0x104   : > { %v1088_v29 = vadd.f32 %v1087_v28, %v1064_v27  ;;  %v1111_v30 = vpop.f32.mrf.mxu3 }
 0x105   : > { %v1135_v31 = vpop.f32.mrf.mxu0 }
 0x106   : > { %v1112_v32 = vadd.f32 %v1111_v30, %v1088_v29 }
 0x108   : > { %v1136_v34 = vadd.f32 %v1135_v31, %v1112_v32  ;;  %v1157_v35 = vpop.f32.mrf.mxu1 }
 0x10a   : > { %v1158_v36 = vadd.f32 %v1157_v35, %v1136_v34  ;;  %v1186_v37 = vpop.f32.mrf.mxu2 }
 0x10c   : > { %v1187_v38 = vadd.f32 %v1186_v37, %v1158_v36  ;;  %v1227_v39 = vpop.f32.mrf.mxu3 }
 0x10d   : > { %v1257_v40 = vpop.f32.mrf.mxu0 }
 0x10e   : > { %v1228_v41 = vadd.f32 %v1227_v39, %v1187_v38 }
 0x110   : > { %v1258_v42 = vadd.f32 %v1257_v40, %v1228_v41  ;;  %v1284_v43 = vpop.f32.mrf.mxu1 }
 0x112   : > { %v1285_v44 = vadd.f32 %v1284_v43, %v1258_v42  ;;  %v1317_v45 = vpop.f32.mrf.mxu2 }
 0x114   : > { %v1318_v46 = vadd.f32 %v1317_v45, %v1285_v44  ;;  %v1342_v47 = vpop.f32.mrf.mxu3 }
 0x116   : > { %v1343_v48 = vadd.f32 %v1342_v47, %v1318_v46 }
 0x118   : > { %1345 = vst.msk [vmem:[#allocation2] sm:$0xff] %vm337_vm1, %v1343_v48 }
 0x119 PF: > { %p1559_p13 = scmp.ge.s32.totalorder %s1861_s23, 2  ;;  %s1376_s15 = sand.u32 1, %s1841_s18  }
 0x11a   : > { %s1377_s28 = scalar_lea.sflag [#allocation5], %s1376_s15 }
 0x11b   : > { %p1547_p0 = pnand %p1559_p13, %p2004_p6 }
 0x11d   : > { %p1548_p3 = pneg %p1547_p0 }
 0x11f   : > { %1836 = dma.done.wait (%p1548_p3), %s1377_s28, 256  }
 0x120   : > { %1838 = vsyncadd (%p1548_p3), %s1377_s28, 4294967040  ;;  %s21_s23 = sadd.s32 1, %s1861_s23   ;;  %s2254_s18 = smov %s1845_s19 }
 0x121   : > { %p18_p5 = scmp.ge.s32.totalorder %s21_s23, 6   ;;  %s2255_s19 = smov %s1849_s20 }
 0x122   : > { %s2256_s20 = smov %s2002_s17  ;;  %s2257_s21 = smov %s1857_s22 }
 0x123   : > { %s2258_s22 = smov %s2260_s11  ;;  %20 = sbr.rel (!%p18_p5) target bundleno = 9 (0x9), region = 104 }
 0x128   :  { %1383 = vsyncpa [#allocation4], 1 }
 0x129   :  { %1385 = vsyncpa [#allocation4 + $0x1], 1 }
 0x12a   :  { %1386 = vsyncpa [#allocation7], 1 }
 0x12b   :  { %1387 = vsyncpa [#allocation10], 1 }
 0x12c   :  { %1388 = vsyncpa [#allocation5], 1 }
 0x12d   :  { %1390 = vsyncpa [#allocation5 + $0x1], 1 }

</bundles_post_ra>
